<compile_context>
chip_gen: v5e
topology: v5e:2x2
jax: 0.10.0
libtpu: 0.0.40
codegen_flags: <defaults>
</compile_context>

<pallas_src>
import functools

import jax
import jax.numpy as jnp
import numpy as np
from jax import lax
from jax.experimental import pallas as pl
from jax.experimental.pallas import tpu as pltpu


def _mixstyle_kernel(x_ref, onehot_ref, lmda_ref, o_ref, *, eps, fma_in_bf16):
    """One grid step = all N samples for a TILE_C slice of channels.

    x_ref:      (N, TILE_C, HW)  native dtype (HW on lanes)
    onehot_ref: (N, K)           f32 one-hot cluster assignment (grid-resident)
    lmda_ref:   (N, 1)           f32 Beta(alpha, alpha) samples (grid-resident)
    o_ref:      (N, TILE_C, HW)  native dtype
    """
    oh = onehot_ref[...]                                # (N, K) f32
    lmda = lmda_ref[...]                                # (N, 1) f32

    # ---- pass 1: per-sample spatial statistics (two-pass, f32 accumulation) ----
    x = x_ref[...].astype(jnp.float32)                  # (N, Ct, HW)
    _, _, HW = x.shape
    hw = jnp.float32(HW)

    s1 = jnp.sum(x, axis=-1)                            # (N, Ct)
    sample_mu = s1 / hw
    d = x - sample_mu[:, :, None]
    ss = jnp.sum(d * d, axis=-1)                        # (N, Ct), >= 0 exactly
    del x, d                                            # end big f32 live range; x_ref re-read below
    var_s = ss / (hw - 1.0)                             # unbiased (torch default)
    sample_std = jnp.sqrt(var_s + eps)
    inv_std = lax.rsqrt(var_s + eps)                    # EUP rsqrt; no VALU divide

    # ---- per-cluster statistics.  K and N are tiny, so use VPU broadcast-
    # multiply + leading-axis sums rather than MXU matmuls. ----
    counts = jnp.sum(oh, axis=0)                        # (K,)  samples per cluster
    n_cl = counts * hw                                  # (K,)  elements per cluster
    oh_t = oh.T                                         # (K, N)

    cl_s1 = jnp.sum(oh[:, :, None] * s1[:, None, :], axis=0)           # (K, Ct)
    cl_mu = cl_s1 / jnp.maximum(n_cl, 1.0)[:, None]                     # (K, Ct)
    # gather each sample's own cluster mean (one-hot select)
    cl_mu_ps = jnp.sum(oh_t[:, :, None] * cl_mu[:, None, :], axis=0)    # (N, Ct)

    # Parallel-variance combine (Chan et al.): per-cluster sum of squared
    # deviations from the cluster mean, built from per-sample two-pass sums.
    dev = sample_mu - cl_mu_ps
    contrib = ss + hw * dev * dev                                        # (N, Ct)
    cl_ss = jnp.sum(oh[:, :, None] * contrib[:, None, :], axis=0)        # (K, Ct)
    cl_var = cl_ss / jnp.maximum(n_cl - 1.0, 1.0)[:, None]               # unbiased
    cl_std = jnp.sqrt(cl_var + eps)
    cl_std_ps = jnp.sum(oh_t[:, :, None] * cl_std[:, None, :], axis=0)   # (N, Ct)
    # NOTE: empty clusters get clamped denominators (finite but meaningless
    # stats); they are never gathered by the one-hot select, matching torch
    # which never materializes empty clusters.

    # ---- fold normalize + mix into one per-(n,c) scale/shift FMA ----
    one_m = 1.0 - lmda
    mu_mix = sample_mu * lmda + cl_mu_ps * one_m         # (N, Ct)
    std_mix = sample_std * lmda + cl_std_ps * one_m      # (N, Ct)
    scale = std_mix * inv_std
    shift = mu_mix - sample_mu * scale

    # ---- pass 2: re-read x (cheap VMEM vld) and apply the FMA on the big tensor ----
    if fma_in_bf16:
        sc = scale.astype(jnp.bfloat16)[:, :, None]
        sh = shift.astype(jnp.bfloat16)[:, :, None]
        o_ref[...] = (x_ref[...] * sc + sh).astype(o_ref.dtype)
    else:
        xb = x_ref[...].astype(jnp.float32)
        o_ref[...] = (xb * scale[:, :, None] + shift[:, :, None]).astype(o_ref.dtype)


def _vmem_budgets():
    """(compute-block VMEM budget, vmem_limit_bytes cap), conservative per chip.

    v7x has 64 MiB physical VMEM per TensorCore (scoped default 32 MiB), so cap the
    request at 48 MiB and budget tiles against ~12 MiB; v5e/v6e (128 MiB physical)
    get a bit more headroom but tiles stay modest so the grid stays long.
    """
    try:
        kind = jax.devices()[0].device_kind.lower()
    except Exception:  # pragma: no cover - defensive
        kind = ""
    if "v7" in kind:
        return 12 * 1024 * 1024, 48 * 1024 * 1024
    return 20 * 1024 * 1024, 64 * 1024 * 1024


def _pick_tile_c(N, C, HW, itemsize, vmem_budget_bytes, min_grid_steps=8):
    """Channel tile: big enough to amortize per-step overhead, small enough to
    (a) fit double-buffered in/out blocks PLUS the single-buffered f32 stats
    intermediates in the VMEM budget and (b) keep the grid >= min_grid_steps so
    BlockSpec pipelining overlaps DMA with compute and v7x megacore sharding has
    multiple tiles per TensorCore.  Prefers an even grid length (v7x has 2 TCs).
    """
    # sublane packing of the second-to-last dim: f32 -> 8 rows, bf16 -> 16, int8 -> 32
    pack = max(8, 32 // max(1, itemsize))
    # live VMEM per channel: double-buffered (in + out) native-dtype blocks plus the
    # f32 intermediates (x upcast, d) held during the stats pass.
    per_c = 2 * 2 * N * HW * itemsize + 2 * 4 * N * HW
    fit_c = max(1, vmem_budget_bytes // per_c)
    want_c = max(1, C // min_grid_steps)          # keep >= min_grid_steps grid steps
    cap = int(min(fit_c, want_c))
    if cap >= C:
        return C                                  # tiny C: whole-C block, grid = (1,)

    best = None
    for p in (pack, 8):                           # bf16 prefers 16-row packing; 8 is still legal
        d = (cap // p) * p
        while d >= p:
            if C % d == 0:
                if best is None:
                    best = d
                if (C // d) % 2 == 0:             # even grid -> balanced v7x megacore split
                    return d
            d -= p
        if best is not None:
            return best

    # TODO(synk): no multiple-of-8 divisor of C fits the budget (huge HW or awkward C);
    # fall back to whole-C and rely on vmem_limit. A spatial (HW) reduction grid axis
    # with scratch accumulation for s1/ss would bound VMEM for e.g. 224x224 maps.
    return C


def cluster_mixstyle_forward(x, cluster_map0, lmda, *, eps=1e-6, tile_c=None):
    """x: (N, C, H, W); cluster_map0: (N, K) logits (== cluster_map[0] in torch);
    lmda: (N,) Beta(alpha, alpha) samples."""
    N, C, H, W = x.shape
    K = cluster_map0.shape[-1]
    HW = H * W

    # glue in plain JAX: argmax -> one-hot assignment, spatial flatten.
    # No dtype cast: keep x in its native dtype end-to-end (bf16 halves HBM bytes).
    cluster_ids = jnp.argmax(cluster_map0, axis=1)                 # (N,)
    onehot = jax.nn.one_hot(cluster_ids, K, dtype=jnp.float32)     # (N, K)
    x_f = x.reshape(N, C, HW)
    lmda2 = lmda.reshape(N, 1).astype(jnp.float32)

    # TODO(synk): when HW % 128 != 0 (e.g. 49/196/784), a channels-on-lanes layout
    # (N, HW, C) with C tiled in multiples of 128 would give unmasked lane-dense
    # stores; not implemented here since it needs an HBM-side transpose.
    itemsize = jnp.dtype(x.dtype).itemsize
    budget, vmem_cap = _vmem_budgets()
    if tile_c is None:
        tile_c = _pick_tile_c(N, C, HW, itemsize, vmem_budget_bytes=budget)
    assert C % tile_c == 0, (C, tile_c)
    grid = (C // tile_c,)

    # VMEM actually used per grid step: double-buffered in/out blocks + f32 intermediates.
    block_bytes = 2 * 2 * N * tile_c * HW * itemsize + 2 * 4 * N * tile_c * HW
    vmem_limit = int(min(vmem_cap, max(32 * 1024 * 1024, block_bytes + (8 << 20))))

    cost = pl.CostEstimate(
        flops=7 * N * C * HW,
        transcendentals=3 * N * C + 2 * K * C,
        bytes_accessed=2 * N * C * HW * itemsize + (N * K + N) * 4,
    )

    fma_in_bf16 = (jnp.dtype(x.dtype) == jnp.dtype(jnp.bfloat16))

    out = pl.pallas_call(
        functools.partial(_mixstyle_kernel, eps=float(eps), fma_in_bf16=fma_in_bf16),
        out_shape=jax.ShapeDtypeStruct((N, C, HW), x.dtype),
        grid=grid,
        in_specs=[
            pl.BlockSpec((N, tile_c, HW), lambda c: (0, c, 0)),   # channel-tiled x
            pl.BlockSpec((N, K), lambda c: (0, 0)),               # resident onehot
            pl.BlockSpec((N, 1), lambda c: (0, 0)),               # resident lmda
        ],
        out_specs=pl.BlockSpec((N, tile_c, HW), lambda c: (0, c, 0)),
        compiler_params=pltpu.CompilerParams(
            dimension_semantics=("parallel",),   # megacore: split C tiles across TCs
            vmem_limit_bytes=vmem_limit,
        ),
        cost_estimate=cost,
    )(x_f, onehot, lmda2)

    return out.reshape(N, C, H, W)


def _reference_forward(x, cluster_map0, lmda, eps=1e-6):
    """Pure-JAX reference mirroring the torch forward (unbiased variance)."""
    N, C, H, W = x.shape
    K = cluster_map0.shape[-1]
    ids = jnp.argmax(cluster_map0, axis=1)
    oh = jax.nn.one_hot(ids, K, dtype=jnp.float32)

    sample_mu = x.mean(axis=(2, 3), keepdims=True)
    sample_var = x.var(axis=(2, 3), keepdims=True, ddof=1)
    sample_std = jnp.sqrt(sample_var + eps)

    xs = x.reshape(N, C, -1)
    counts = oh.sum(0)
    n = counts * H * W
    csum = jnp.einsum('nk,ncs->kc', oh, xs)
    csq = jnp.einsum('nk,ncs->kc', oh, xs * xs)
    cmu = csum / jnp.maximum(n, 1.0)[:, None]
    cvar = (csq - n[:, None] * cmu * cmu) / jnp.maximum(n - 1.0, 1.0)[:, None]
    cstd = jnp.sqrt(cvar + eps)
    cmu_ps = cmu[ids][:, :, None, None]
    cstd_ps = cstd[ids][:, :, None, None]

    lm = lmda.reshape(N, 1, 1, 1)
    xn = (x - sample_mu) / sample_std
    mu_mix = sample_mu * lm + cmu_ps * (1.0 - lm)
    std_mix = sample_std * lm + cstd_ps * (1.0 - lm)
    return xn * std_mix + mu_mix


if __name__ == "__main__":
    key = jax.random.PRNGKey(0)
    k_x, k_c, k_l, k_x2, k_c2, k_l2, k_x4, k_c4, k_l4 = jax.random.split(key, 9)

    alpha = 0.1     # Beta distribution parameter from __init__
    eps = 1e-6
    # TODO(synk): the host-side `random.random() > p` gate and the train/eval
    # switch are Python control flow outside the kernel; the mixing branch is
    # always taken here.

    # --- test 1: small shape, whole-C block (grid = 1), f32 ---
    N, C, H, W, K = 2, 4, 16, 16, 3
    x = jax.random.normal(k_x, (N, C, H, W), dtype=jnp.float32)
    cluster_map0 = jax.random.normal(k_c, (N, K), dtype=jnp.float32)  # == cluster_map[0]
    lmda = jax.random.beta(k_l, alpha, alpha, shape=(N,), dtype=jnp.float32)

    out = cluster_mixstyle_forward(x, cluster_map0, lmda, eps=eps)
    out = jax.block_until_ready(out)
    ref = _reference_forward(x, cluster_map0, lmda, eps=eps)
    np.testing.assert_allclose(np.asarray(out), np.asarray(ref), rtol=1e-4, atol=1e-4)

    # --- test 2: explicit channel-tiled grid path (C=16, TILE_C=8 -> grid=(2,)), f32 ---
    N2, C2, H2, W2 = 4, 16, 16, 16
    x2 = jax.random.normal(k_x2, (N2, C2, H2, W2), dtype=jnp.float32)
    cmap2 = jax.random.normal(k_c2, (N2, K), dtype=jnp.float32)
    lmda2 = jax.random.beta(k_l2, alpha, alpha, shape=(N2,), dtype=jnp.float32)

    out2 = cluster_mixstyle_forward(x2, cmap2, lmda2, eps=eps, tile_c=8)
    out2 = jax.block_until_ready(out2)
    ref2 = _reference_forward(x2, cmap2, lmda2, eps=eps)
    np.testing.assert_allclose(np.asarray(out2), np.asarray(ref2), rtol=1e-4, atol=1e-4)

    # --- test 3: native bf16 input (halved HBM bytes, bf16 final FMA), whole-C block ---
    x_bf = x.astype(jnp.bfloat16)
    out3 = cluster_mixstyle_forward(x_bf, cluster_map0, lmda, eps=eps)
    out3 = jax.block_until_ready(out3)
    ref3 = _reference_forward(x_bf.astype(jnp.float32), cluster_map0, lmda, eps=eps)
    np.testing.assert_allclose(np.asarray(out3, dtype=np.float32), np.asarray(ref3),
                               rtol=2.5e-2, atol=2.5e-2)

    # --- test 4: auto tile policy on a wider channel dim (bf16, C=128 ->
    #     tile_c=16, grid=(8,): multi-step pipelined grid, even for megacore) ---
    N4, C4, H4, W4 = 4, 128, 16, 16
    x4 = jax.random.normal(k_x4, (N4, C4, H4, W4), dtype=jnp.float32).astype(jnp.bfloat16)
    cmap4 = jax.random.normal(k_c4, (N4, K), dtype=jnp.float32)
    lmda4 = jax.random.beta(k_l4, alpha, alpha, shape=(N4,), dtype=jnp.float32)

    out4 = cluster_mixstyle_forward(x4, cmap4, lmda4, eps=eps)
    out4 = jax.block_until_ready(out4)
    ref4 = _reference_forward(x4.astype(jnp.float32), cmap4, lmda4, eps=eps)
    np.testing.assert_allclose(np.asarray(out4, dtype=np.float32), np.asarray(ref4),
                               rtol=2.5e-2, atol=2.5e-2)

    print("KERNEL_OK")
</pallas_src>

<mosaic_0001>
module attributes {stable_mosaic.version = 11 : i64} {
  func.func @_mixstyle_kernel(%arg0: i32, %arg1: memref<2x4x256xf32, #tpu.memory_space<vmem>>, %arg2: memref<2x3xf32, #tpu.memory_space<vmem>>, %arg3: memref<2x1xf32, #tpu.memory_space<vmem>>, %arg4: memref<2x4x256xf32, #tpu.memory_space<vmem>>) attributes {dimension_semantics = [#tpu.dimension_semantics<parallel>], iteration_bounds = array<i64: 1>, scalar_prefetch = 0 : i64, scratch_operands = 0 : i64, tpu.core_type = #tpu.core_type<tc>, window_params = [{transform_indices = @transform_0, window_bounds = array<i64: 2, 4, 256>}, {pipeline_mode = #tpu.pipeline_mode<synchronous>, transform_indices = @transform_1, window_bounds = array<i64: 2, 3>}, {pipeline_mode = #tpu.pipeline_mode<synchronous>, transform_indices = @transform_2, window_bounds = array<i64: 2, 1>}, {transform_indices = @transform_3, window_bounds = array<i64: 2, 4, 256>}]} {
    %c0 = arith.constant 0 : index
    %c0_0 = arith.constant 0 : index
    %0 = vector.load %arg2[%c0, %c0_0] : memref<2x3xf32, #tpu.memory_space<vmem>>, vector<2x3xf32>
    %c0_1 = arith.constant 0 : index
    %c0_2 = arith.constant 0 : index
    %1 = vector.load %arg3[%c0_1, %c0_2] : memref<2x1xf32, #tpu.memory_space<vmem>>, vector<2x1xf32>
    %c0_3 = arith.constant 0 : index
    %c0_4 = arith.constant 0 : index
    %c0_5 = arith.constant 0 : index
    %2 = vector.load %arg1[%c0_3, %c0_4, %c0_5] : memref<2x4x256xf32, #tpu.memory_space<vmem>>, vector<2x4x256xf32>
    %cst = arith.constant dense<0.000000e+00> : vector<2x4xf32>
    %3 = vector.multi_reduction <add>, %2, %cst [2] : vector<2x4x256xf32> to vector<2x4xf32>
    %cst_6 = arith.constant 2.560000e+02 : f32
    %4 = vector.broadcast %cst_6 : f32 to vector<2x4xf32>
    %5 = arith.divf %3, %4 : vector<2x4xf32>
    %6 = vector.shape_cast %5 : vector<2x4xf32> to vector<2x4x1xf32>
    %7 = vector.broadcast %6 : vector<2x4x1xf32> to vector<2x4x256xf32>
    %8 = arith.subf %2, %7 : vector<2x4x256xf32>
    %9 = arith.mulf %8, %8 : vector<2x4x256xf32>
    %cst_7 = arith.constant dense<0.000000e+00> : vector<2x4xf32>
    %10 = vector.multi_reduction <add>, %9, %cst_7 [2] : vector<2x4x256xf32> to vector<2x4xf32>
    %cst_8 = arith.constant 2.560000e+02 : f32
    %cst_9 = arith.constant 1.000000e+00 : f32
    %11 = arith.subf %cst_8, %cst_9 : f32
    %12 = vector.broadcast %11 : f32 to vector<2x4xf32>
    %13 = arith.divf %10, %12 : vector<2x4xf32>
    %cst_10 = arith.constant 9.99999997E-7 : f32
    %14 = vector.broadcast %cst_10 : f32 to vector<2x4xf32>
    %15 = arith.addf %13, %14 : vector<2x4xf32>
    %16 = math.sqrt %15 : vector<2x4xf32>
    %cst_11 = arith.constant 9.99999997E-7 : f32
    %17 = vector.broadcast %cst_11 : f32 to vector<2x4xf32>
    %18 = arith.addf %13, %17 : vector<2x4xf32>
    %19 = math.rsqrt %18 : vector<2x4xf32>
    %cst_12 = arith.constant dense<0.000000e+00> : vector<3xf32>
    %20 = vector.multi_reduction <add>, %0, %cst_12 [0] : vector<2x3xf32> to vector<3xf32>
    %cst_13 = arith.constant 2.560000e+02 : f32
    %21 = vector.broadcast %cst_13 : f32 to vector<3xf32>
    %22 = arith.mulf %20, %21 : vector<3xf32>
    %23 = tpu.transpose %0, [1, 0] : vector<2x3xf32> -> vector<3x2xf32>
    %24 = vector.shape_cast %0 : vector<2x3xf32> to vector<2x3x1xf32>
    %25 = vector.shape_cast %3 : vector<2x4xf32> to vector<2x1x4xf32>
    %26 = vector.broadcast %24 : vector<2x3x1xf32> to vector<2x3x4xf32>
    %27 = vector.broadcast %25 : vector<2x1x4xf32> to vector<2x3x4xf32>
    %28 = arith.mulf %26, %27 : vector<2x3x4xf32>
    %cst_14 = arith.constant dense<0.000000e+00> : vector<3x4xf32>
    %29 = vector.multi_reduction <add>, %28, %cst_14 [0] : vector<2x3x4xf32> to vector<3x4xf32>
    %cst_15 = arith.constant 1.000000e+00 : f32
    %30 = vector.broadcast %cst_15 : f32 to vector<3xf32>
    %31 = arith.maximumf %22, %30 : vector<3xf32>
    %32 = vector.shape_cast %31 : vector<3xf32> to vector<3x1xf32>
    %33 = vector.broadcast %32 : vector<3x1xf32> to vector<3x4xf32>
    %34 = arith.divf %29, %33 : vector<3x4xf32>
    %35 = vector.shape_cast %23 : vector<3x2xf32> to vector<3x2x1xf32>
    %36 = vector.shape_cast %34 : vector<3x4xf32> to vector<3x1x4xf32>
    %37 = vector.broadcast %35 : vector<3x2x1xf32> to vector<3x2x4xf32>
    %38 = vector.broadcast %36 : vector<3x1x4xf32> to vector<3x2x4xf32>
    %39 = arith.mulf %37, %38 : vector<3x2x4xf32>
    %cst_16 = arith.constant dense<0.000000e+00> : vector<2x4xf32>
    %40 = vector.multi_reduction <add>, %39, %cst_16 [0] : vector<3x2x4xf32> to vector<2x4xf32>
    %41 = arith.subf %5, %40 : vector<2x4xf32>
    %cst_17 = arith.constant 2.560000e+02 : f32
    %42 = vector.broadcast %cst_17 : f32 to vector<2x4xf32>
    %43 = arith.mulf %42, %41 : vector<2x4xf32>
    %44 = arith.mulf %43, %41 : vector<2x4xf32>
    %45 = arith.addf %10, %44 : vector<2x4xf32>
    %46 = vector.shape_cast %0 : vector<2x3xf32> to vector<2x3x1xf32>
    %47 = vector.shape_cast %45 : vector<2x4xf32> to vector<2x1x4xf32>
    %48 = vector.broadcast %46 : vector<2x3x1xf32> to vector<2x3x4xf32>
    %49 = vector.broadcast %47 : vector<2x1x4xf32> to vector<2x3x4xf32>
    %50 = arith.mulf %48, %49 : vector<2x3x4xf32>
    %cst_18 = arith.constant dense<0.000000e+00> : vector<3x4xf32>
    %51 = vector.multi_reduction <add>, %50, %cst_18 [0] : vector<2x3x4xf32> to vector<3x4xf32>
    %cst_19 = arith.constant 1.000000e+00 : f32
    %52 = vector.broadcast %cst_19 : f32 to vector<3xf32>
    %53 = arith.subf %22, %52 : vector<3xf32>
    %cst_20 = arith.constant 1.000000e+00 : f32
    %54 = vector.broadcast %cst_20 : f32 to vector<3xf32>
    %55 = arith.maximumf %53, %54 : vector<3xf32>
    %56 = vector.shape_cast %55 : vector<3xf32> to vector<3x1xf32>
    %57 = vector.broadcast %56 : vector<3x1xf32> to vector<3x4xf32>
    %58 = arith.divf %51, %57 : vector<3x4xf32>
    %cst_21 = arith.constant 9.99999997E-7 : f32
    %59 = vector.broadcast %cst_21 : f32 to vector<3x4xf32>
    %60 = arith.addf %58, %59 : vector<3x4xf32>
    %61 = math.sqrt %60 : vector<3x4xf32>
    %62 = vector.shape_cast %23 : vector<3x2xf32> to vector<3x2x1xf32>
    %63 = vector.shape_cast %61 : vector<3x4xf32> to vector<3x1x4xf32>
    %64 = vector.broadcast %62 : vector<3x2x1xf32> to vector<3x2x4xf32>
    %65 = vector.broadcast %63 : vector<3x1x4xf32> to vector<3x2x4xf32>
    %66 = arith.mulf %64, %65 : vector<3x2x4xf32>
    %cst_22 = arith.constant dense<0.000000e+00> : vector<2x4xf32>
    %67 = vector.multi_reduction <add>, %66, %cst_22 [0] : vector<3x2x4xf32> to vector<2x4xf32>
    %cst_23 = arith.constant 1.000000e+00 : f32
    %68 = vector.broadcast %cst_23 : f32 to vector<2x1xf32>
    %69 = arith.subf %68, %1 : vector<2x1xf32>
    %70 = vector.broadcast %1 : vector<2x1xf32> to vector<2x4xf32>
    %71 = arith.mulf %5, %70 : vector<2x4xf32>
    %72 = vector.broadcast %69 : vector<2x1xf32> to vector<2x4xf32>
    %73 = arith.mulf %40, %72 : vector<2x4xf32>
    %74 = arith.addf %71, %73 : vector<2x4xf32>
    %75 = vector.broadcast %1 : vector<2x1xf32> to vector<2x4xf32>
    %76 = arith.mulf %16, %75 : vector<2x4xf32>
    %77 = vector.broadcast %69 : vector<2x1xf32> to vector<2x4xf32>
    %78 = arith.mulf %67, %77 : vector<2x4xf32>
    %79 = arith.addf %76, %78 : vector<2x4xf32>
    %80 = arith.mulf %79, %19 : vector<2x4xf32>
    %81 = arith.mulf %5, %80 : vector<2x4xf32>
    %82 = arith.subf %74, %81 : vector<2x4xf32>
    %c0_24 = arith.constant 0 : index
    %c0_25 = arith.constant 0 : index
    %c0_26 = arith.constant 0 : index
    %83 = vector.load %arg1[%c0_24, %c0_25, %c0_26] : memref<2x4x256xf32, #tpu.memory_space<vmem>>, vector<2x4x256xf32>
    %84 = vector.shape_cast %80 : vector<2x4xf32> to vector<2x4x1xf32>
    %85 = vector.broadcast %84 : vector<2x4x1xf32> to vector<2x4x256xf32>
    %86 = arith.mulf %83, %85 : vector<2x4x256xf32>
    %87 = vector.shape_cast %82 : vector<2x4xf32> to vector<2x4x1xf32>
    %88 = vector.broadcast %87 : vector<2x4x1xf32> to vector<2x4x256xf32>
    %89 = arith.addf %86, %88 : vector<2x4x256xf32>
    %c0_27 = arith.constant 0 : index
    %c0_28 = arith.constant 0 : index
    %c0_29 = arith.constant 0 : index
    %90 = vector.load %arg4[%c0_27, %c0_28, %c0_29] : memref<2x4x256xf32, #tpu.memory_space<vmem>>, vector<2x4x256xf32>
    tpu.vector_store %arg4[%c0_27, %c0_28, %c0_29], %89 {strides = array<i32>} : memref<2x4x256xf32, #tpu.memory_space<vmem>>, vector<2x4x256xf32>,
    return
  }
  func.func @transform_0(%arg0: i32) -> (i32, i32, i32) {
    %c0_i32 = arith.constant 0 : i32
    %c0_i32_0 = arith.constant 0 : i32
    %c0_i32_1 = arith.constant 0 : i32
    return %c0_i32, %arg0, %c0_i32_0 : i32, i32, i32
  }
  func.func @transform_1(%arg0: i32) -> (i32, i32) {
    %c0_i32 = arith.constant 0 : i32
    %c0_i32_0 = arith.constant 0 : i32
    %c0_i32_1 = arith.constant 0 : i32
    return %c0_i32, %c0_i32_0 : i32, i32
  }
  func.func @transform_2(%arg0: i32) -> (i32, i32) {
    %c0_i32 = arith.constant 0 : i32
    %c0_i32_0 = arith.constant 0 : i32
    %c0_i32_1 = arith.constant 0 : i32
    return %c0_i32, %c0_i32_0 : i32, i32
  }
  func.func @transform_3(%arg0: i32) -> (i32, i32, i32) {
    %c0_i32 = arith.constant 0 : i32
    %c0_i32_0 = arith.constant 0 : i32
    %c0_i32_1 = arith.constant 0 : i32
    return %c0_i32, %arg0, %c0_i32_0 : i32, i32, i32
  }
}

</mosaic_0001>

<bundles_post_ra>
// kernel: tpu_custom_call.1
= control target key start
LH: loop header
LB: loop body
LE: loop exit
PB: predicated region body
PF: predicated region fallthrough
CT: control target
= control target key end

     0   :  { %8 = vsyncpa [#allocation3], 0  ;;  %s745_s0 = inlined_call_operand.hbm [shape: f32[2,4,256], index: 0, kind: input, shape index: {}]   ;;  %s746_s1 = inlined_call_operand.vmem [shape: f32[2,3], index: 1, kind: input, shape index: {}]   ;;  %s747_s2 = inlined_call_operand.vmem [shape: f32[2,1], index: 2, kind: input, shape index: {}]   ;;  %s748_s3 = inlined_call_operand.hbm [shape: f32[2,4,256], index: 3, kind: output, shape index: {}]  }
   0x1   :  { %9 = vsyncpa [#allocation4], 0  ;;  %s14_s14 = sshll.u32 %s745_s0, 4  ;;  %s601_s15 = smov [#allocation2]   ;;  %s15_s14 = int_to_ptr.hbm [resolvable:$true] %s14_s14 }
   0x2   :  { %s16_s16 = sshll.u32 %s601_s15, 4  ;;  %s602_s17 = smov 128   ;;  %s17_s16 = int_to_ptr.vmem [resolvable:$true] %s16_s16 }
   0x3   :  { %s603_s18 = smov 8  }
   0x4   :  { %22 = dma.hbm_to_vmem [thread:$0]  %s15_s14, 256, %s17_s16, [#allocation3], %s602_s17, %s602_s17, %s603_s18  }
   0x5   :  { %597 = dma.done.wait [#allocation3], 256  }
   0x6   :  { %598 = vsyncadd [#allocation3], 4294967040  ;;  %v204_v0 = vlaneseq  ;;  %vm162_vm0 = vcmask 17408   ;;  %v31_v2 = vld [vmem:[%s746_s1] sm:$0x3]  ;;  %v644_v3 = vld [vmem:[#allocation2] sm:$0xff] }
   0x7   :  { %v646_v4 = vld [vmem:[#allocation2 + $0x8] sm:$0xff]  ;;  %v163_v5 = vsel %vm162_vm0, %v31_v2, 0.0  ;;  %37 = vst [vmem:[#allocation1] ss:$2 sm:$0xff] %v644_v3  ;;  %v203_v6 = vperm.slane %v31_v2, 0  ;;  %vm48_vm1 = vcmask 1043456  }
   0x8   :  { %v636_v1 = vshrl.u32 %v204_v0, 7  ;;  %v164_v7 = vrot.slane %v163_v5, 4  ;;  %41 = vst [vmem:[#allocation1 + $0x10] ss:$2 sm:$0xff] %v646_v4  ;;  %v210_v25 = vperm.slane %v31_v2, 1  ;;  %v604_v26 = vmov 256.0  }
   0x9   :  { %535 = vrcp.f32 %v604_v26  ;;  %v605_v31 = vmov 839922192   ;;  %vm230_vm4 = vcmask 26624   ;;  %vm289_vm8 = vcmask 25600   ;;  %s504_s24 = sshll.u32 %s748_s3, 4  ;;  %s505_s24 = int_to_ptr.hbm [resolvable:$true] %s504_s24 }
   0xa   :  { %527 = vset.pattern.permute.xlu0 %v636_v1  ;;  %528 = vset.pattern.permute.xlu2 %v636_v1  ;;  %v165_v8 = vadd.f32 %v164_v7, %v163_v5  ;;  %v71_v32 = vunpack.c.l.s4 %v605_v31 }
   0xb   :  { %529 = vset.pattern.permute.xlu1 %v636_v1 }
   0xc   :  { %v166_v9 = vrot.slane %v165_v8, 2  ;;  %v657_v36 = vunpack.c.0.s8 %v71_v32 }
   0xe   :  { %v167_v10 = vadd.f32 %v166_v9, %v165_v8  ;;  %v38_v11 = vld.sshfl [vmem:[#allocation1] sm:$0xff pattern:$0x75316420]  ;;  %v39_v12 = vld.sshfl [vmem:[#allocation1 + $0x8] sm:$0xff pattern:$0x75316420] }
   0xf   :  { %v49_v13 = vsel %vm48_vm1, %v38_v11, 0.0  ;;  %v50_v14 = vsel %vm48_vm1, %v39_v12, 0.0  ;;  %v42_v15 = vld.sshfl [vmem:[#allocation1 + $0x10] sm:$0xff pattern:$0x75316420]  ;;  %v536_v27 = vpop.eup %535 }
  0x10   :  { %v168_v16 = vrot.slane %v167_v10, 1  ;;  %v51_v17 = vadd.f32 %v50_v14, %v49_v13  ;;  %v43_v18 = vld.sshfl [vmem:[#allocation1 + $0x18] sm:$0xff pattern:$0x75316420]  ;;  %v54_v20 = vsel %vm48_vm1, %v42_v15, 0.0  ;;  %v60_v28 = vmul.f32 256.0, %v536_v27 }
  0x11   :  { %v55_v21 = vsel %vm48_vm1, %v43_v18, 0.0  ;;  %vm64_vm2 = vweird.f32 %v536_v27 }
  0x12   :  { %208 = vperm.xlu2 %528, %v203_v6   ;;  %v169_v19 = vadd.f32 %v168_v16, %v167_v10  ;;  %52 = vadd.xlane.f32.xlu1 %v51_v17  ;;  %v56_v24 = vadd.f32 %v55_v21, %v54_v20  ;;  %v61_v29 = vsub.f32 1.0, %v60_v28 }
  0x14   :  { %v654_v22 = vmul.f32 256.0, %v169_v19  ;;  %v62_v30 = vmul.f32 %v536_v27, %v61_v29 }
  0x16   :  { %v234_v23 = vmax.f32 %v654_v22, 1.0  ;;  %v63_v34 = vadd.f32 %v536_v27, %v62_v30 }
  0x18   :  { %239 = vperm.xlu0 %527, %v234_v23   ;;  %v65_v35 = vsel %vm64_vm2, %v536_v27, %v63_v34 }
  0x1a   :  { %57 = vadd.xlane.f32.xlu1 %v56_v24  ;;  %215 = vperm.xlu2 %528, %v210_v25  }
  0x3a   :  { %171 = vxpose.xlu0.b32.start.end [1/1] (short) (narrow) %v31_v2, 8  ;;  %v676_v2 = vand.u32 127, %v204_v0 }
  0x6c   :  { %v673_v62 = vpop.permute.xlu2 %208 }
  0x74   :  { %v680_v9 = vpop.permute.xlu2 %215 }
  0x85   :  { %v53_v33 = vpop.xlane.xlu1 %52 }
  0x86   :  { %v659_v37 = vmul.f32 %v65_v35, %v53_v33  ;;  %v221_v6 = vperm.slane %v53_v33, %v676_v2 }
  0x88   :  { %v73_v38 = vperm.slane %v659_v37, %v657_v36  ;;  %v228_v10 = vmul.f32 %v221_v6, %v673_v62 }
  0x8a   :  { %v80_v40 = vsub.f32 %v644_v3, %v73_v38  ;;  %v240_v46 = vpop.permute.xlu0 %239  ;;  %v231_v0 = vsel %vm230_vm4, %v228_v10, 0.0 }
  0x8b   :  { %537 = vrcp.f32 %v240_v46  ;;  %v252_v13 = vand.u32 2147483648, %v240_v46  ;;  %vm246_vm5 = vweird.f32 %v240_v46  ;;  %v250_v14 = vand.u32 2147483647, %v240_v46 }
  0x8c   :  { %v82_v42 = vmul.f32 %v80_v40, %v80_v40 }
  0x8d   :  { %v58_v39 = vpop.xlane.xlu1 %57  ;;  %v253_v17 = vor.u32 1.1754944e-38, %v252_v13  ;;  %vm251_vm7 = vcmp.eq.f32.partialorder %v250_v14, 8.507059e+37 }
  0x8e   :  { %v664_v41 = vmul.f32 %v65_v35, %v58_v39  ;;  %86 = vst [vmem:[#allocation1] ss:$2 sm:$0xff] %v82_v42  ;;  %v222_v7 = vperm.slane %v58_v39, %v676_v2 }
  0x90   :  { %v77_v43 = vperm.slane %v664_v41, %v657_v36  ;;  %v229_v11 = vmul.f32 %v222_v7, %v680_v9 }
  0x91   :  { %v538_v61 = vpop.eup %537 }
  0x92   :  { %v81_v44 = vsub.f32 %v646_v4, %v77_v43  ;;  %v242_v63 = vmul.f32 %v538_v61, %v240_v46  ;;  %vm247_vm3 = vweird.f32 %v538_v61  ;;  %v232_v15 = vsel %vm230_vm4, %v229_v11, 0.0 }
  0x93   :  { %vm248_vm6 = vmor %vm246_vm5, %vm247_vm3  ;;  %v233_v18 = vadd.f32 %v232_v15, %v231_v0  ;;  %v517_v43 = vadd.f32 -1.0, %v654_v22 }
  0x94   :  { %v83_v45 = vmul.f32 %v81_v44, %v81_v44  ;;  %v243_v5 = vsub.f32 1.0, %v242_v63 }
  0x95   :  { %v87_v51 = vld.sshfl [vmem:[#allocation1] sm:$0xff pattern:$0x75316420]  ;;  %v88_v52 = vld.sshfl [vmem:[#allocation1 + $0x8] sm:$0xff pattern:$0x75316420] }
  0x96   :  { %90 = vst [vmem:[#allocation1 + $0x10] ss:$2 sm:$0xff] %v83_v45  ;;  %v97_v53 = vsel %vm48_vm1, %v87_v51, 0.0  ;;  %v98_v54 = vsel %vm48_vm1, %v88_v52, 0.0  ;;  %v244_v8 = vmul.f32 %v538_v61, %v243_v5  ;;  %v340_v44 = vmax.f32 %v517_v43, 1.0 }
  0x97   :  { %v99_v55 = vadd.f32 %v98_v54, %v97_v53  ;;  %v606_v45 = vmov 0  }
  0x98   :  { %v245_v12 = vadd.f32 %v538_v61, %v244_v8 }
  0x9a   :  { %v249_v16 = vsel %vm248_vm6, %v538_v61, %v245_v12 }
  0x9b   :  { %v254_v19 = vsel %vm251_vm7, %v253_v17, %v249_v16 }
  0x9c   :  { %v255_v21 = vmul.f32 %v254_v19, %v233_v18 }
  0x9d   :  { %v91_v56 = vld.sshfl [vmem:[#allocation1 + $0x10] sm:$0xff pattern:$0x75316420]  ;;  %v92_v57 = vld.sshfl [vmem:[#allocation1 + $0x18] sm:$0xff pattern:$0x75316420] }
  0x9e   :  { %v102_v58 = vsel %vm48_vm1, %v91_v56, 0.0  ;;  %v103_v59 = vsel %vm48_vm1, %v92_v57, 0.0  ;;  %v278_v23 = vrot.slane %v255_v21, 1  ;;  %v279_v24 = vrot.slane %v255_v21, 2  ;;  %v32_v57 = vld [vmem:[%s747_s2] sm:$0x3] }
  0x9f   :  { %v104_v60 = vadd.f32 %v103_v59, %v102_v58  ;;  %v280_v29 = vperm.slane %v255_v21, 0  ;;  %v392_v58 = vsub.f32 1.0, %v32_v57  ;;  %s608_s2 = smov [#allocation5]  }
  0xa0   :  { %v281_v25 = vperm.slane %v278_v23, 0  ;;  %v282_v28 = vperm.slane %v279_v24, 0  ;;  %s502_s21 = sshll.u32 %s608_s2, 4  ;;  %s503_s21 = int_to_ptr.vmem [resolvable:$true] %s502_s21 }
  0xa1   :  { %534 = vset.pattern.permute.xlu0 %v606_v45 }
  0xab   :  { %105 = vadd.xlane.f32.xlu0 %v104_v60 }
  0xde   :  { %v187_v47 = vpop.trf.xlu0 }
  0xdf   :  { %v256_v48 = vperm.slane %v187_v47, 0  ;;  %v263_v49 = vperm.slane %v187_v47, 1  ;;  %v270_v50 = vperm.slane %v187_v47, 2 }
  0xe1   :  { %268 = vperm.xlu2 %528, %v263_v49   ;;  %261 = vperm.xlu1 %529, %v256_v48  }
  0xe9   :  { %275 = vperm.xlu2 %528, %v270_v50  }
 0x10b   :  { %100 = vadd.xlane.f32.xlu1 %v99_v55 }
 0x11e   :  { %v706_v55 = vpop.xlane.xlu0 %105 }
 0x13b   :  { %v686_v20 = vpop.permute.xlu2 %268 }
 0x13c   :  { %v287_v27 = vmul.f32 %v281_v25, %v686_v20 }
 0x13e   :  { %v291_v33 = vsel %vm289_vm8, %v287_v27, 0.0 }
 0x143   :  { %v688_v26 = vpop.permute.xlu2 %275 }
 0x144   :  { %v288_v31 = vmul.f32 %v282_v28, %v688_v26 }
 0x146   :  { %v293_v38 = vsel %vm289_vm8, %v288_v31, 0.0 }
 0x153   :  { %v691_v30 = vpop.permute.xlu1 %261 }
 0x154   :  { %v286_v32 = vmul.f32 %v280_v29, %v691_v30 }
 0x156   :  { %v290_v34 = vsel %vm289_vm8, %v286_v32, 0.0 }
 0x157   :  { %v292_v35 = vadd.f32 %v291_v33, %v290_v34 }
 0x159   :  { %v294_v39 = vadd.f32 %v293_v38, %v292_v35 }
 0x15b   :  { %v296_v40 = vperm.slane %v294_v39, 0  ;;  %v303_v42 = vperm.slane %v294_v39, 1 }
 0x15d   :  { %301 = vperm.xlu2 %528, %v296_v40  }
 0x165   :  { %308 = vperm.xlu2 %528, %v303_v42  }
 0x16d   :  { %345 = vperm.xlu2 %528, %v340_v44  }
 0x175   :  { %530 = vset.pattern.permute.xlu2 %v606_v45 }
 0x17e   :  { %v702_v50 = vpop.xlane.xlu1 %100 }
 0x1b7   :  { %v302_v46 = vpop.permute.xlu2 %301 }
 0x1b8   :  { %v312_v47 = vsub.f32 %v659_v37, %v302_v46 }
 0x1ba   :  { %v314_v48 = vmul.f32 256.0, %v312_v47 }
 0x1bc   :  { %v316_v49 = vmul.f32 %v314_v48, %v312_v47 }
 0x1be   :  { %v318_v51 = vadd.f32 %v316_v49, %v702_v50 }
 0x1bf   :  { %v309_v52 = vpop.permute.xlu2 %308 }
 0x1c0   :  { %v313_v53 = vsub.f32 %v664_v41, %v309_v52  ;;  %323 = vperm.xlu2 %530, %v318_v51  }
 0x1c2   :  { %v315_v22 = vmul.f32 256.0, %v313_v53 }
 0x1c4   :  { %v317_v54 = vmul.f32 %v315_v22, %v313_v53 }
 0x1c6   :  { %v319_v56 = vadd.f32 %v317_v54, %v706_v55 }
 0x1c7   :  { %v346_v59 = vpop.permute.xlu2 %345 }
 0x1c8   :  { %326 = vperm.xlu2 %530, %v319_v56   ;;  %539 = vrcp.f32 %v346_v59  ;;  %v358_v11 = vand.u32 2147483648, %v346_v59  ;;  %vm352_vm10 = vweird.f32 %v346_v59  ;;  %v356_v14 = vand.u32 2147483647, %v346_v59 }
 0x1ca   :  { %v359_v15 = vor.u32 1.1754944e-38, %v358_v11  ;;  %vm357_vm12 = vcmp.eq.f32.partialorder %v356_v14, 8.507059e+37 }
 0x1ce   :  { %v540_v60 = vpop.eup %539 }
 0x1cf   :  { %v348_v61 = vmul.f32 %v540_v60, %v346_v59  ;;  %vm353_vm9 = vweird.f32 %v540_v60 }
 0x1d0   :  { %405 = vperm.xlu2 %530, %v392_v58   ;;  %vm354_vm11 = vmor %vm352_vm10, %vm353_vm9 }
 0x1d1   :  { %v349_v63 = vsub.f32 1.0, %v348_v61 }
 0x1d3   :  { %v350_v6 = vmul.f32 %v540_v60, %v349_v63 }
 0x1d5   :  { %v351_v8 = vadd.f32 %v540_v60, %v350_v6 }
 0x1d7   :  { %v355_v0 = vsel %vm354_vm11, %v540_v60, %v351_v8 }
 0x1d8   :  { %395 = vperm.xlu2 %530, %v32_v57   ;;  %v360_v19 = vsel %vm357_vm12, %v359_v15, %v355_v0 }
 0x1e0   :  { %531 = vset.pattern.permute.xlu2 %v636_v1 }
 0x21a   :  { %v324_v5 = vpop.permute.xlu2 %323 }
 0x21b   :  { %v328_v7 = vperm.slane %v324_v5, %v676_v2 }
 0x21d   :  { %v334_v12 = vmul.f32 %v328_v7, %v673_v62 }
 0x21f   :  { %v336_v16 = vsel %vm230_vm4, %v334_v12, 0.0 }
 0x222   :  { %v327_v10 = vpop.permute.xlu2 %326 }
 0x223   :  { %v329_v13 = vperm.slane %v327_v10, %v676_v2 }
 0x225   :  { %v335_v1 = vmul.f32 %v329_v13, %v680_v9 }
 0x227   :  { %v337_v17 = vsel %vm230_vm4, %v335_v1, 0.0 }
 0x228   :  { %v338_v18 = vadd.f32 %v337_v17, %v336_v16 }
 0x22a   :  { %v361_v21 = vmul.f32 %v360_v19, %v338_v18  ;;  %v406_v23 = vpop.permute.xlu2 %405 }
 0x22b   :  { %v408_v24 = vmul.f32 %v406_v23, %v294_v39 }
 0x22c   :  { %v362_v62 = vadd.f32 1e-06, %v361_v21 }
 0x22d   :  { %v410_v25 = vperm.slane %v408_v24, 0  ;;  %v417_v57 = vperm.slane %v408_v24, 1 }
 0x22e   :  { %541 = vrsqrt.f32 %v362_v62  ;;  %vm370_vm13 = vcmp.eq.f32.partialorder %v362_v62, inf  ;;  %v373_v33 = vand.u32 2147483648, %v362_v62  ;;  %vm372_vm14 = vcmp.eq.f32.partialorder %v362_v62, 0.0 }
 0x22f   :  { %415 = vperm.xlu2 %531, %v410_v25  }
 0x232   :  { %v396_v13 = vpop.permute.xlu2 %395 }
 0x233   :  { %v398_v17 = vperm.slane %v396_v13, 1 }
 0x234   :  { %v542_v2 = vpop.eup %541 }
 0x235   :  { %v364_v27 = vmul.f32 %v542_v2, %v362_v62 }
 0x237   :  { %v365_v28 = vmul.f32 %v542_v2, %v364_v27  ;;  %v402_v27 = vmul.f32 %v398_v17, %v664_v41 }
 0x239   :  { %v366_v9 = vmul.f32 0.5, %v365_v28 }
 0x23b   :  { %v367_v29 = vsub.f32 1.5, %v366_v9 }
 0x23d   :  { %v368_v31 = vmul.f32 %v542_v2, %v367_v29 }
 0x23f   :  { %v369_v32 = vmul.f32 %v368_v31, %v362_v62 }
 0x241   :  { %v371_v34 = vsel %vm370_vm13, %v362_v62, %v369_v32 }
 0x242   :  { %v374_v35 = vsel %vm372_vm14, %v373_v33, %v371_v34 }
 0x243   :  { %v376_v38 = vrot.slane %v374_v35, 1  ;;  %v377_v40 = vrot.slane %v374_v35, 2  ;;  %v378_v42 = vperm.slane %v374_v35, 0 }
 0x245   :  { %v379_v39 = vperm.slane %v376_v38, 0  ;;  %v380_v43 = vperm.slane %v377_v40, 0  ;;  %v384_v44 = vmul.f32 %v378_v42, %v691_v30  ;;  %v397_v38 = vperm.slane %v396_v13, 0 }
 0x247   :  { %v385_v46 = vmul.f32 %v379_v39, %v686_v20  ;;  %v386_v47 = vmul.f32 %v380_v43, %v688_v26  ;;  %v387_v48 = vsel %vm289_vm8, %v384_v44, 0.0  ;;  %v607_v20 = vmov 255.0  }
 0x248   :  { %543 = vrcp.f32 %v607_v20 }
 0x249   :  { %v388_v49 = vsel %vm289_vm8, %v385_v46, 0.0  ;;  %v390_v52 = vsel %vm289_vm8, %v386_v47, 0.0 }
 0x24a   :  { %v389_v51 = vadd.f32 %v388_v49, %v387_v48 }
 0x24c   :  { %v391_v53 = vadd.f32 %v390_v52, %v389_v51 }
 0x24e   :  { %v430_v22 = vmul.f32 %v406_v23, %v391_v53  ;;  %v544_v26 = vpop.eup %543 }
 0x24f   :  { %v108_v30 = vmul.f32 255.0, %v544_v26  ;;  %vm112_vm15 = vweird.f32 %v544_v26 }
 0x250   :  { %v432_v54 = vperm.slane %v430_v22, 0  ;;  %v439_v56 = vperm.slane %v430_v22, 1 }
 0x251   :  { %v109_v58 = vsub.f32 1.0, %v108_v30 }
 0x252   :  { %437 = vperm.xlu1 %529, %v432_v54   ;;  %444 = vperm.xlu2 %531, %v439_v56  }
 0x253   :  { %v110_v59 = vmul.f32 %v544_v26, %v109_v58 }
 0x255   :  { %v111_v60 = vadd.f32 %v544_v26, %v110_v59 }
 0x257   :  { %v113_v61 = vsel %vm112_vm15, %v544_v26, %v111_v60 }
 0x258   :  { %v115_v63 = vmul.f32 %v113_v61, %v706_v55  ;;  %v114_v10 = vmul.f32 %v113_v61, %v702_v50 }
 0x25a   :  { %422 = vperm.xlu2 %531, %v417_v57   ;;  %532 = vset.pattern.permute.xlu1 %v606_v45  ;;  %v117_v5 = vadd.f32 1e-06, %v115_v63 }
 0x25c   :  { %545 = vrsqrt.f32 %v117_v5  ;;  %vm137_vm0 = vcmp.eq.f32.partialorder %v117_v5, inf  ;;  %v140_v16 = vand.u32 2147483648, %v117_v5  ;;  %vm139_vm1 = vcmp.eq.f32.partialorder %v117_v5, 0.0 }
 0x25d   :  { %vm158_vm2 = vweird.f32 %v117_v5 }
 0x262   :  { %533 = vset.pattern.permute.xlu2 %v606_v45  ;;  %v546_v6 = vpop.eup %545  ;;  %v116_v45 = vadd.f32 1e-06, %v114_v10 }
 0x263   :  { %v131_v7 = vmul.f32 %v546_v6, %v117_v5  ;;  %vm159_vm3 = vweird.f32 %v546_v6 }
 0x264   :  { %547 = vrsqrt.f32 %v116_v45  ;;  %vm160_vm4 = vmor %vm158_vm2, %vm159_vm3  ;;  %vm125_vm5 = vcmp.eq.f32.partialorder %v116_v45, inf  ;;  %v128_v35 = vand.u32 2147483648, %v116_v45  ;;  %vm127_vm6 = vcmp.eq.f32.partialorder %v116_v45, 0.0 }
 0x265   :  { %v132_v8 = vmul.f32 %v546_v6, %v131_v7  ;;  %vm148_vm7 = vweird.f32 %v116_v45 }
 0x267   :  { %v133_v11 = vmul.f32 0.5, %v132_v8 }
 0x269   :  { %v134_v12 = vsub.f32 1.5, %v133_v11 }
 0x26a   :  { %v548_v0 = vpop.eup %547 }
 0x26b   :  { %v135_v14 = vmul.f32 %v546_v6, %v134_v12  ;;  %v119_v18 = vmul.f32 %v548_v0, %v116_v45  ;;  %vm149_vm8 = vweird.f32 %v548_v0 }
 0x26c   :  { %vm150_vm9 = vmor %vm148_vm7, %vm149_vm8 }
 0x26d   :  { %v136_v1 = vmul.f32 %v135_v14, %v117_v5  ;;  %v120_v21 = vmul.f32 %v548_v0, %v119_v18  ;;  %v161_v62 = vsel %vm160_vm4, %v546_v6, %v135_v14 }
 0x26f   :  { %v138_v55 = vsel %vm137_vm0, %v117_v5, %v136_v1  ;;  %v121_v2 = vmul.f32 0.5, %v120_v21 }
 0x270   :  { %v141_v19 = vsel %vm139_vm1, %v140_v16, %v138_v55 }
 0x271   :  { %v429_v50 = vmul.f32 %v398_v17, %v141_v19  ;;  %v122_v28 = vsub.f32 1.5, %v121_v2 }
 0x273   :  { %v123_v33 = vmul.f32 %v548_v0, %v122_v28 }
 0x275   :  { %v124_v34 = vmul.f32 %v123_v33, %v116_v45  ;;  %v151_v46 = vsel %vm150_vm9, %v548_v0, %v123_v33 }
 0x277   :  { %v126_v40 = vsel %vm125_vm5, %v116_v45, %v124_v34 }
 0x278   :  { %v129_v42 = vsel %vm127_vm6, %v128_v35, %v126_v40 }
 0x279   :  { %v428_v39 = vmul.f32 %v397_v38, %v129_v42 }
 0x289   :  { %v416_v15 = vpop.permute.xlu2 %415 }
 0x2ac   :  { %v445_v23 = vpop.permute.xlu2 %444 }
 0x2ad   :  { %v449_v24 = vadd.f32 %v445_v23, %v429_v50 }
 0x2af   :  { %v451_v25 = vmul.f32 %v449_v24, %v161_v62 }
 0x2b1   :  { %462 = vperm.xlu2 %533, %v451_v25   ;;  %v453_v31 = vmul.f32 %v451_v25, %v664_v41  ;;  %v401_v41 = vmul.f32 %v397_v38, %v659_v37 }
 0x2b3   :  { %v426_v49 = vadd.f32 %v416_v15, %v401_v41 }
 0x2b4   :  { %v423_v9 = vpop.permute.xlu2 %422 }
 0x2b5   :  { %v427_v29 = vadd.f32 %v423_v9, %v402_v27 }
 0x2b7   :  { %v455_v32 = vsub.f32 %v427_v29, %v453_v31 }
 0x2b9   :  { %482 = vperm.xlu2 %533, %v455_v32  }
 0x2c4   :  { %v438_v43 = vpop.permute.xlu1 %437 }
 0x2c5   :  { %v448_v44 = vadd.f32 %v438_v43, %v428_v39 }
 0x2c7   :  { %v450_v47 = vmul.f32 %v448_v44, %v151_v46 }
 0x2c9   :  { %458 = vperm.xlu1 %532, %v450_v47   ;;  %v452_v48 = vmul.f32 %v450_v47, %v659_v37 }
 0x2cb   :  { %v454_v51 = vsub.f32 %v426_v49, %v452_v48 }
 0x2d1   :  { %478 = vperm.xlu1 %532, %v454_v51  }
 0x30b   :  { %v463_v52 = vpop.permute.xlu2 %462 }
 0x30c   :  { %v471_v53 = vperm.slane %v463_v52, %v657_v36 }
 0x30e   :  { %v475_v54 = vmul.f32 %v471_v53, %v646_v4 }
 0x313   :  { %v483_v22 = vpop.permute.xlu2 %482 }
 0x314   :  { %v491_v56 = vperm.slane %v483_v22, %v657_v36 }
 0x316   :  { %v495_v57 = vadd.f32 %v491_v56, %v475_v54 }
 0x318   :  { %497 = vst [vmem:[#allocation5 + $0x8] sm:$0xff] %v495_v57 }
 0x33b   :  { %v459_v20 = vpop.permute.xlu1 %458 }
 0x33c   :  { %v467_v26 = vperm.slane %v459_v20, %v657_v36 }
 0x33e   :  { %v474_v37 = vmul.f32 %v467_v26, %v644_v3 }
 0x343   :  { %v479_v30 = vpop.permute.xlu1 %478 }
 0x344   :  { %v487_v58 = vperm.slane %v479_v30, %v657_v36 }
 0x346   :  { %v494_v59 = vadd.f32 %v487_v58, %v474_v37 }
 0x348   :  { %496 = vst [vmem:[#allocation5] sm:$0xff] %v494_v59 }
 0x349   :  { %510 = dma.vmem_to_hbm [thread:$0]  %s503_s21, 256, %s505_s24, [#allocation4], %s602_s17, %s602_s17, %s603_s18  }
 0x34a   :  { %599 = dma.done.wait [#allocation4], 256  }
 0x34b   :  { %600 = vsyncadd [#allocation4], 4294967040 }
 0x34c   :  { %515 = vsyncpa [#allocation3], 1 }
 0x34d   :  { %516 = vsyncpa [#allocation4], 1 }

</bundles_post_ra>
